<compile_context>
chip_gen: v7x
topology: tpu7x:2x2x1
jax: 0.10.0
libtpu: 0.0.40
codegen_flags: <defaults>
</compile_context>

<pallas_src>
import functools

import jax
import jax.numpy as jnp
from jax.experimental import pallas as pl
from jax.experimental.pallas import tpu as pltpu


def _round_up(x, m):
    return (x + m - 1) // m * m


def _pad_cast(x, shape, dtype):
    """Cast to dtype and zero-pad up to `shape` (no-op when already there)."""
    x = x.astype(dtype)
    pads = [(0, s - d) for s, d in zip(shape, x.shape)]
    if any(p for _, p in pads):
        x = jnp.pad(x, pads)
    return x


def _pick_tiles(n, row_tile, k_tile):
    """Row tile (mult of 8, >=2 grid steps for 2-TC chips) and K tile."""
    if n <= 8:
        tm = 8
    else:
        tm = min(_round_up(row_tile, 8), _round_up(-(-n // 2), 8))
    n_pad = _round_up(n, tm)
    if tm % 128 == 0:
        # Largest multiple of tm that divides n_pad and is <= k_tile.
        n_kt = n_pad // tm
        m = max(1, min(n_kt, max(1, k_tile // tm)))
        while n_kt % m != 0:
            m -= 1
        tk = tm * m
    else:
        tk = n_pad  # small graphs: single K step, full-width columns.
    return tm, tk, n_pad


def _vmem_limit_bytes(tm, tk, f_pad, h_pad, itemsize):
    try:
        cap = int(pltpu.get_tpu_info().vmem_capacity_bytes)
    except Exception:  # pragma: no cover - conservative fallback
        cap = 128 << 20
    # Double-buffered input blocks + output block + f32 accumulator + headroom.
    need = 2 * itemsize * (tm * tk + tk * f_pad + tm * f_pad
                           + f_pad * h_pad + h_pad * f_pad)
    need += 2 * 4 * (tm * f_pad + tm + h_pad + f_pad)   # out, dis, b1, b2
    need += 4 * tm * f_pad                              # accumulator scratch
    need += 8 << 20                                     # compiler headroom
    return int(min(max(need, 32 << 20), cap - (8 << 20)))


# --------------------------------------------------------------------------
# Kernels
# --------------------------------------------------------------------------
def _layer1_kernel(adj_ref, xsk_ref, xsr_ref, dis_ref, w1_ref, b1_ref, w2_ref,
                   s2_ref, acc_ref):
    """S2s row tile = dis * ( relu( dis*(A@Xs + 2*Xs) @ W1 + b1 ) @ W2 )."""
    k = pl.program_id(1)

    @pl.when(k == 0)
    def _init():
        acc_ref[...] = jnp.zeros_like(acc_ref)

    acc_ref[...] += jnp.dot(adj_ref[...], xsk_ref[...],
                            preferred_element_type=jnp.float32)

    @pl.when(k == pl.num_programs(1) - 1)
    def _epilogue():
        dis_row = dis_ref[...]                                       # (tm,1) f32
        # (L @ X) row tile, all elementwise math in f32.
        lx = (acc_ref[...] + 2.0 * xsr_ref[...].astype(jnp.float32)) * dis_row
        h1 = jnp.dot(lx.astype(w1_ref.dtype), w1_ref[...],
                     preferred_element_type=jnp.float32) + b1_ref[...]
        x1 = jnp.maximum(h1, 0.0)
        # TODO(synk): F.dropout(p=0.05) is identity in eval mode; not implemented.
        s2 = jnp.dot(x1.astype(w2_ref.dtype), w2_ref[...],
                     preferred_element_type=jnp.float32)
        # Store pre-scaled by dis so layer 2 is a pure aggregation matmul.
        s2_ref[...] = (s2 * dis_row).astype(s2_ref.dtype)


def _layer2_kernel(adj_ref, s2k_ref, s2r_ref, dis_ref, b2_ref, out_ref, acc_ref):
    """out row tile = dis * (A @ S2s + 2*S2s) + b2."""
    k = pl.program_id(1)

    @pl.when(k == 0)
    def _init():
        acc_ref[...] = jnp.zeros_like(acc_ref)

    acc_ref[...] += jnp.dot(adj_ref[...], s2k_ref[...],
                            preferred_element_type=jnp.float32)

    @pl.when(k == pl.num_programs(1) - 1)
    def _epilogue():
        dis_row = dis_ref[...]
        out = (acc_ref[...] + 2.0 * s2r_ref[...].astype(jnp.float32)) * dis_row \
            + b2_ref[...]
        out_ref[...] = out.astype(out_ref.dtype)


# --------------------------------------------------------------------------
# Wrapper
# --------------------------------------------------------------------------
def self_loop_attention_gcn(adj, features, a, w1, b1, w2, b2, *,
                            row_tile=512, k_tile=4096,
                            compute_dtype=jnp.bfloat16):
    """Forward pass of self_loop_attention_GCN (eval mode).

    `a` is kept only for interface parity: softmax over a size-1 axis == 1, so
    the attention diagonal is exactly the identity.  compute_dtype=bfloat16
    (default) halves the HBM adjacency stream; use float32 for bit-tight
    comparisons against an f32 reference.
    """
    del a  # provably unused (enhanced_attention == I)

    n, f = features.shape
    h = w1.shape[1]
    f32 = jnp.float32

    tm, tk, n_pad = _pick_tiles(n, row_tile, k_tile)
    f_pad = _round_up(f, 128)
    h_pad = _round_up(h, 128)

    # Degree scaling and feature pre-scaling in plain XLA (fused with padding).
    adj_f32 = adj.astype(f32)
    d = jnp.sum(adj_f32, axis=1)
    dis = jnp.where(d > 0.0, d ** -0.5, 0.0)                 # (n,)
    xs = dis[:, None] * features.astype(f32)                 # column-scaled X

    adj_p = _pad_cast(adj_f32, (n_pad, n_pad), compute_dtype)
    xs_p = _pad_cast(xs, (n_pad, f_pad), compute_dtype)
    dis_p = _pad_cast(dis[:, None], (n_pad, 1), f32)
    w1_p = _pad_cast(w1, (f_pad, h_pad), compute_dtype)
    w2_p = _pad_cast(w2, (h_pad, f_pad), compute_dtype)
    b1_p = _pad_cast(b1.reshape(1, -1), (1, h_pad), f32)
    b2_p = _pad_cast(b2.reshape(1, -1), (1, f_pad), f32)

    grid = (n_pad // tm, n_pad // tk)
    cparams = pltpu.CompilerParams(
        dimension_semantics=("parallel", "arbitrary"),
        vmem_limit_bytes=_vmem_limit_bytes(
            tm, tk, f_pad, h_pad, jnp.dtype(compute_dtype).itemsize))

    adj_spec = pl.BlockSpec((tm, tk), lambda i, k: (i, k))
    col_spec = pl.BlockSpec((tk, f_pad), lambda i, k: (k, 0))   # K block
    row_spec = pl.BlockSpec((tm, f_pad), lambda i, k: (i, 0))   # row tile / output
    dis_spec = pl.BlockSpec((tm, 1), lambda i, k: (i, 0))

    # --- layer 1: S2s = dis * ( relu((L@X) @ W1 + b1) @ W2 ) ----------------
    s2s = pl.pallas_call(
        _layer1_kernel,
        out_shape=jax.ShapeDtypeStruct((n_pad, f_pad), compute_dtype),
        grid_spec=pltpu.PrefetchScalarGridSpec(
            num_scalar_prefetch=0,
            grid=grid,
            in_specs=[
                adj_spec,                                         # A (i,k) tile
                col_spec,                                         # Xs K tile
                row_spec,                                         # Xs row tile (2*I term)
                dis_spec,                                         # dis rows
                pl.BlockSpec((f_pad, h_pad), lambda i, k: (0, 0)),  # W1
                pl.BlockSpec((1, h_pad), lambda i, k: (0, 0)),      # b1
                pl.BlockSpec((h_pad, f_pad), lambda i, k: (0, 0)),  # W2
            ],
            out_specs=row_spec,
            scratch_shapes=[pltpu.VMEM((tm, f_pad), jnp.float32)],
        ),
        compiler_params=cparams,
    )(adj_p, xs_p, xs_p, dis_p, w1_p, b1_p, w2_p)

    # --- layer 2: out = dis * (A @ S2s + 2*S2s) + b2 -------------------------
    out_p = pl.pallas_call(
        _layer2_kernel,
        out_shape=jax.ShapeDtypeStruct((n_pad, f_pad), f32),
        grid_spec=pltpu.PrefetchScalarGridSpec(
            num_scalar_prefetch=0,
            grid=grid,
            in_specs=[
                adj_spec,                                         # A (i,k) tile
                col_spec,                                         # S2s K tile
                row_spec,                                         # S2s row tile
                dis_spec,                                         # dis rows
                pl.BlockSpec((1, f_pad), lambda i, k: (0, 0)),      # b2
            ],
            out_specs=row_spec,
            scratch_shapes=[pltpu.VMEM((tm, f_pad), jnp.float32)],
        ),
        compiler_params=cparams,
    )(adj_p, s2s, s2s, dis_p, b2_p)

    return out_p[:n, :f]


# --------------------------------------------------------------------------
# Pure-JAX reference (mirrors the PyTorch forward, eval mode)
# --------------------------------------------------------------------------
def _reference(adj, features, a, w1, b1, w2, b2):
    n = adj.shape[0]
    scores = jnp.einsum("nf,hfo->hno", features, a)                  # (nhead,N,1)
    attn = jnp.mean(jax.nn.softmax(scores, axis=-1), axis=0)[:, 0]   # all ones
    d = jnp.sum(adj, axis=1)
    dis = jnp.where(d > 0.0, d ** -0.5, 0.0)
    lap = dis[:, None] * (adj + jnp.diag(attn) + jnp.eye(n, dtype=adj.dtype)) \
        * dis[None, :]
    x = jax.nn.relu(lap @ (features @ w1) + b1)
    return lap @ (x @ w2) + b2


if __name__ == "__main__":
    # Small shapes consistent with the module: N nodes, nfeat features, ratio=2.
    N, NFEAT, NHEAD, RATIO = 16, 8, 4, 2
    NHID = NFEAT * RATIO

    key = jax.random.PRNGKey(0)
    k_adj, k_feat, k_a, k_w1, k_b1, k_w2, k_b2 = jax.random.split(key, 7)

    # adjacency: symmetric, nonnegative (binary)
    adj_raw = (jax.random.uniform(k_adj, (N, N)) > 0.6).astype(jnp.float32)
    adj = jnp.maximum(adj_raw, adj_raw.T)
    features = jax.random.normal(k_feat, (N, NFEAT), dtype=jnp.float32)

    # deterministic parameter init mirroring reset_parameters():
    stdv_a = 1.0 / (NFEAT ** 0.5)                     # a.size(1) == nfeat
    a = jax.random.uniform(k_a, (NHEAD, NFEAT, 1), minval=-stdv_a, maxval=stdv_a)

    stdv1 = 1.0 / (NHID ** 0.5)                       # gc1: out_features = nhid
    w1 = jax.random.uniform(k_w1, (NFEAT, NHID), minval=-stdv1, maxval=stdv1)
    b1 = jax.random.uniform(k_b1, (NHID,), minval=-stdv1, maxval=stdv1)

    stdv2 = 1.0 / (NFEAT ** 0.5)                      # gc2: out_features = nfeat
    w2 = jax.random.uniform(k_w2, (NHID, NFEAT), minval=-stdv2, maxval=stdv2)
    b2 = jax.random.uniform(k_b2, (NFEAT,), minval=-stdv2, maxval=stdv2)

    ref = _reference(adj, features, a, w1, b1, w2, b2)

    # f32 path: bit-tight vs the f32 reference.
    gcn_f32 = jax.jit(functools.partial(self_loop_attention_gcn,
                                        compute_dtype=jnp.float32))
    out_f32 = jax.block_until_ready(gcn_f32(adj, features, a, w1, b1, w2, b2))
    assert out_f32.shape == (N, NFEAT)
    assert jnp.allclose(out_f32, ref, atol=1e-4, rtol=1e-4), "f32 mismatch vs reference"

    # default bf16 path (adjacency / 2*I exact in bf16; features rounded).
    gcn_bf16 = jax.jit(functools.partial(self_loop_attention_gcn))
    out_bf16 = jax.block_until_ready(gcn_bf16(adj, features, a, w1, b1, w2, b2))
    assert jnp.allclose(out_bf16, ref, atol=5e-2, rtol=5e-2), "bf16 mismatch vs reference"

    print("KERNEL_OK")
</pallas_src>

<mosaic_0001>
module attributes {stable_mosaic.version = 11 : i64} {
  func.func @_layer1_kernel(%arg0: i32, %arg1: i32, %arg2: memref<8x16xf32, #tpu.memory_space<vmem>>, %arg3: memref<16x128xf32, #tpu.memory_space<vmem>>, %arg4: memref<8x128xf32, #tpu.memory_space<vmem>>, %arg5: memref<8x1xf32, #tpu.memory_space<vmem>>, %arg6: memref<128x128xf32, #tpu.memory_space<vmem>>, %arg7: memref<1x128xf32, #tpu.memory_space<vmem>>, %arg8: memref<128x128xf32, #tpu.memory_space<vmem>>, %arg9: memref<8x128xf32, #tpu.memory_space<vmem>>, %arg10: memref<8x128xf32, #tpu.memory_space<vmem>>) attributes {dimension_semantics = [#tpu.dimension_semantics<parallel>, #tpu.dimension_semantics<arbitrary>], iteration_bounds = array<i64: 2, 1>, scalar_prefetch = 0 : i64, scratch_operands = 1 : i64, tpu.core_type = #tpu.core_type<tc>, window_params = [{transform_indices = @transform_0, window_bounds = array<i64: 8, 16>}, {transform_indices = @transform_1, window_bounds = array<i64: 16, 128>}, {transform_indices = @transform_2, window_bounds = array<i64: 8, 128>}, {transform_indices = @transform_3, window_bounds = array<i64: 8, 1>}, {pipeline_mode = #tpu.pipeline_mode<synchronous>, transform_indices = @transform_4, window_bounds = array<i64: 128, 128>}, {pipeline_mode = #tpu.pipeline_mode<synchronous>, transform_indices = @transform_5, window_bounds = array<i64: 1, 128>}, {pipeline_mode = #tpu.pipeline_mode<synchronous>, transform_indices = @transform_6, window_bounds = array<i64: 128, 128>}, {transform_indices = @transform_7, window_bounds = array<i64: 8, 128>}]} {
    %c0_i32 = arith.constant 0 : i32
    %0 = arith.cmpi eq, %arg1, %c0_i32 : i32
    %1 = arith.extui %0 : i1 to i32
    %c0_i32_0 = arith.constant 0 : i32
    %2 = arith.cmpi ne, %1, %c0_i32_0 : i32
    scf.if %2 {
      %cst_10 = arith.constant 0.000000e+00 : f32
      %12 = vector.broadcast %cst_10 : f32 to vector<8x128xf32>
      %c0_11 = arith.constant 0 : index
      %c0_12 = arith.constant 0 : index
      %13 = vector.load %arg10[%c0_11, %c0_12] : memref<8x128xf32, #tpu.memory_space<vmem>>, vector<8x128xf32>
      tpu.vector_store %arg10[%c0_11, %c0_12], %12 {strides = array<i32>} : memref<8x128xf32, #tpu.memory_space<vmem>>, vector<8x128xf32>,
    } else {
    }
    %c0 = arith.constant 0 : index
    %c0_1 = arith.constant 0 : index
    %3 = vector.load %arg10[%c0, %c0_1] : memref<8x128xf32, #tpu.memory_space<vmem>>, vector<8x128xf32>
    %c0_2 = arith.constant 0 : index
    %c0_3 = arith.constant 0 : index
    %4 = vector.load %arg2[%c0_2, %c0_3] : memref<8x16xf32, #tpu.memory_space<vmem>>, vector<8x16xf32>
    %c0_4 = arith.constant 0 : index
    %c0_5 = arith.constant 0 : index
    %5 = vector.load %arg3[%c0_4, %c0_5] : memref<16x128xf32, #tpu.memory_space<vmem>>, vector<16x128xf32>
    %cst = arith.constant dense<0.000000e+00> : vector<8x128xf32>
    %6 = tpu.matmul %4, %5, %cst {dimension_numbers = #tpu.dot_dimension_numbers<[1], [0], [0], [1], [0, 0, 1, 1], [], []>} : vector<8x16xf32>, vector<16x128xf32>, vector<8x128xf32> -> vector<8x128xf32>
    %7 = arith.addf %3, %6 : vector<8x128xf32>
    %c0_6 = arith.constant 0 : index
    %c0_7 = arith.constant 0 : index
    %8 = vector.load %arg10[%c0_6, %c0_7] : memref<8x128xf32, #tpu.memory_space<vmem>>, vector<8x128xf32>
    tpu.vector_store %arg10[%c0_6, %c0_7], %7 {strides = array<i32>} : memref<8x128xf32, #tpu.memory_space<vmem>>, vector<8x128xf32>,
    %c0_i32_8 = arith.constant 0 : i32
    %9 = arith.cmpi eq, %arg1, %c0_i32_8 : i32
    %10 = arith.extui %9 : i1 to i32
    %c0_i32_9 = arith.constant 0 : i32
    %11 = arith.cmpi ne, %10, %c0_i32_9 : i32
    scf.if %11 {
      %c0_10 = arith.constant 0 : index
      %c0_11 = arith.constant 0 : index
      %12 = vector.load %arg5[%c0_10, %c0_11] : memref<8x1xf32, #tpu.memory_space<vmem>>, vector<8x1xf32>
      %c0_12 = arith.constant 0 : index
      %c0_13 = arith.constant 0 : index
      %13 = vector.load %arg10[%c0_12, %c0_13] : memref<8x128xf32, #tpu.memory_space<vmem>>, vector<8x128xf32>
      %c0_14 = arith.constant 0 : index
      %c0_15 = arith.constant 0 : index
      %14 = vector.load %arg4[%c0_14, %c0_15] : memref<8x128xf32, #tpu.memory_space<vmem>>, vector<8x128xf32>
      %cst_16 = arith.constant 2.000000e+00 : f32
      %15 = vector.broadcast %cst_16 : f32 to vector<8x128xf32>
      %16 = arith.mulf %15, %14 : vector<8x128xf32>
      %17 = arith.addf %13, %16 : vector<8x128xf32>
      %18 = vector.broadcast %12 : vector<8x1xf32> to vector<8x128xf32>
      %19 = arith.mulf %17, %18 : vector<8x128xf32>
      %c0_17 = arith.constant 0 : index
      %c0_18 = arith.constant 0 : index
      %20 = vector.load %arg6[%c0_17, %c0_18] : memref<128x128xf32, #tpu.memory_space<vmem>>, vector<128x128xf32>
      %cst_19 = arith.constant dense<0.000000e+00> : vector<8x128xf32>
      %21 = tpu.matmul %19, %20, %cst_19 {dimension_numbers = #tpu.dot_dimension_numbers<[1], [0], [0], [1], [0, 0, 1, 1], [], []>} : vector<8x128xf32>, vector<128x128xf32>, vector<8x128xf32> -> vector<8x128xf32>
      %c0_20 = arith.constant 0 : index
      %c0_21 = arith.constant 0 : index
      %22 = vector.load %arg7[%c0_20, %c0_21] : memref<1x128xf32, #tpu.memory_space<vmem>>, vector<1x128xf32>
      %23 = vector.broadcast %22 : vector<1x128xf32> to vector<8x128xf32>
      %24 = arith.addf %21, %23 : vector<8x128xf32>
      %cst_22 = arith.constant 0.000000e+00 : f32
      %25 = vector.broadcast %cst_22 : f32 to vector<8x128xf32>
      %26 = arith.maximumf %24, %25 : vector<8x128xf32>
      %c0_23 = arith.constant 0 : index
      %c0_24 = arith.constant 0 : index
      %27 = vector.load %arg8[%c0_23, %c0_24] : memref<128x128xf32, #tpu.memory_space<vmem>>, vector<128x128xf32>
      %cst_25 = arith.constant dense<0.000000e+00> : vector<8x128xf32>
      %28 = tpu.matmul %26, %27, %cst_25 {dimension_numbers = #tpu.dot_dimension_numbers<[1], [0], [0], [1], [0, 0, 1, 1], [], []>} : vector<8x128xf32>, vector<128x128xf32>, vector<8x128xf32> -> vector<8x128xf32>
      %29 = vector.broadcast %12 : vector<8x1xf32> to vector<8x128xf32>
      %30 = arith.mulf %28, %29 : vector<8x128xf32>
      %c0_26 = arith.constant 0 : index
      %c0_27 = arith.constant 0 : index
      %31 = vector.load %arg9[%c0_26, %c0_27] : memref<8x128xf32, #tpu.memory_space<vmem>>, vector<8x128xf32>
      tpu.vector_store %arg9[%c0_26, %c0_27], %30 {strides = array<i32>} : memref<8x128xf32, #tpu.memory_space<vmem>>, vector<8x128xf32>,
    } else {
    }
    return
  }
  func.func @transform_0(%arg0: i32, %arg1: i32) -> (i32, i32) {
    %c0_i32 = arith.constant 0 : i32
    return %arg0, %arg1 : i32, i32
  }
  func.func @transform_1(%arg0: i32, %arg1: i32) -> (i32, i32) {
    %c0_i32 = arith.constant 0 : i32
    %c0_i32_0 = arith.constant 0 : i32
    return %arg1, %c0_i32 : i32, i32
  }
  func.func @transform_2(%arg0: i32, %arg1: i32) -> (i32, i32) {
    %c0_i32 = arith.constant 0 : i32
    %c0_i32_0 = arith.constant 0 : i32
    return %arg0, %c0_i32 : i32, i32
  }
  func.func @transform_3(%arg0: i32, %arg1: i32) -> (i32, i32) {
    %c0_i32 = arith.constant 0 : i32
    %c0_i32_0 = arith.constant 0 : i32
    return %arg0, %c0_i32 : i32, i32
  }
  func.func @transform_4(%arg0: i32, %arg1: i32) -> (i32, i32) {
    %c0_i32 = arith.constant 0 : i32
    %c0_i32_0 = arith.constant 0 : i32
    %c0_i32_1 = arith.constant 0 : i32
    return %c0_i32, %c0_i32_0 : i32, i32
  }
  func.func @transform_5(%arg0: i32, %arg1: i32) -> (i32, i32) {
    %c0_i32 = arith.constant 0 : i32
    %c0_i32_0 = arith.constant 0 : i32
    %c0_i32_1 = arith.constant 0 : i32
    return %c0_i32, %c0_i32_0 : i32, i32
  }
  func.func @transform_6(%arg0: i32, %arg1: i32) -> (i32, i32) {
    %c0_i32 = arith.constant 0 : i32
    %c0_i32_0 = arith.constant 0 : i32
    %c0_i32_1 = arith.constant 0 : i32
    return %c0_i32, %c0_i32_0 : i32, i32
  }
  func.func @transform_7(%arg0: i32, %arg1: i32) -> (i32, i32) {
    %c0_i32 = arith.constant 0 : i32
    %c0_i32_0 = arith.constant 0 : i32
    return %arg0, %c0_i32 : i32, i32
  }
}

module attributes {stable_mosaic.version = 11 : i64} {
  func.func @_layer2_kernel(%arg0: i32, %arg1: i32, %arg2: memref<8x16xf32, #tpu.memory_space<vmem>>, %arg3: memref<16x128xf32, #tpu.memory_space<vmem>>, %arg4: memref<8x128xf32, #tpu.memory_space<vmem>>, %arg5: memref<8x1xf32, #tpu.memory_space<vmem>>, %arg6: memref<1x128xf32, #tpu.memory_space<vmem>>, %arg7: memref<8x128xf32, #tpu.memory_space<vmem>>, %arg8: memref<8x128xf32, #tpu.memory_space<vmem>>) attributes {dimension_semantics = [#tpu.dimension_semantics<parallel>, #tpu.dimension_semantics<arbitrary>], iteration_bounds = array<i64: 2, 1>, scalar_prefetch = 0 : i64, scratch_operands = 1 : i64, tpu.core_type = #tpu.core_type<tc>, window_params = [{transform_indices = @transform_0, window_bounds = array<i64: 8, 16>}, {transform_indices = @transform_1, window_bounds = array<i64: 16, 128>}, {transform_indices = @transform_2, window_bounds = array<i64: 8, 128>}, {transform_indices = @transform_3, window_bounds = array<i64: 8, 1>}, {pipeline_mode = #tpu.pipeline_mode<synchronous>, transform_indices = @transform_4, window_bounds = array<i64: 1, 128>}, {transform_indices = @transform_5, window_bounds = array<i64: 8, 128>}]} {
    %c0_i32 = arith.constant 0 : i32
    %0 = arith.cmpi eq, %arg1, %c0_i32 : i32
    %1 = arith.extui %0 : i1 to i32
    %c0_i32_0 = arith.constant 0 : i32
    %2 = arith.cmpi ne, %1, %c0_i32_0 : i32
    scf.if %2 {
      %cst_10 = arith.constant 0.000000e+00 : f32
      %12 = vector.broadcast %cst_10 : f32 to vector<8x128xf32>
      %c0_11 = arith.constant 0 : index
      %c0_12 = arith.constant 0 : index
      %13 = vector.load %arg8[%c0_11, %c0_12] : memref<8x128xf32, #tpu.memory_space<vmem>>, vector<8x128xf32>
      tpu.vector_store %arg8[%c0_11, %c0_12], %12 {strides = array<i32>} : memref<8x128xf32, #tpu.memory_space<vmem>>, vector<8x128xf32>,
    } else {
    }
    %c0 = arith.constant 0 : index
    %c0_1 = arith.constant 0 : index
    %3 = vector.load %arg8[%c0, %c0_1] : memref<8x128xf32, #tpu.memory_space<vmem>>, vector<8x128xf32>
    %c0_2 = arith.constant 0 : index
    %c0_3 = arith.constant 0 : index
    %4 = vector.load %arg2[%c0_2, %c0_3] : memref<8x16xf32, #tpu.memory_space<vmem>>, vector<8x16xf32>
    %c0_4 = arith.constant 0 : index
    %c0_5 = arith.constant 0 : index
    %5 = vector.load %arg3[%c0_4, %c0_5] : memref<16x128xf32, #tpu.memory_space<vmem>>, vector<16x128xf32>
    %cst = arith.constant dense<0.000000e+00> : vector<8x128xf32>
    %6 = tpu.matmul %4, %5, %cst {dimension_numbers = #tpu.dot_dimension_numbers<[1], [0], [0], [1], [0, 0, 1, 1], [], []>} : vector<8x16xf32>, vector<16x128xf32>, vector<8x128xf32> -> vector<8x128xf32>
    %7 = arith.addf %3, %6 : vector<8x128xf32>
    %c0_6 = arith.constant 0 : index
    %c0_7 = arith.constant 0 : index
    %8 = vector.load %arg8[%c0_6, %c0_7] : memref<8x128xf32, #tpu.memory_space<vmem>>, vector<8x128xf32>
    tpu.vector_store %arg8[%c0_6, %c0_7], %7 {strides = array<i32>} : memref<8x128xf32, #tpu.memory_space<vmem>>, vector<8x128xf32>,
    %c0_i32_8 = arith.constant 0 : i32
    %9 = arith.cmpi eq, %arg1, %c0_i32_8 : i32
    %10 = arith.extui %9 : i1 to i32
    %c0_i32_9 = arith.constant 0 : i32
    %11 = arith.cmpi ne, %10, %c0_i32_9 : i32
    scf.if %11 {
      %c0_10 = arith.constant 0 : index
      %c0_11 = arith.constant 0 : index
      %12 = vector.load %arg5[%c0_10, %c0_11] : memref<8x1xf32, #tpu.memory_space<vmem>>, vector<8x1xf32>
      %c0_12 = arith.constant 0 : index
      %c0_13 = arith.constant 0 : index
      %13 = vector.load %arg8[%c0_12, %c0_13] : memref<8x128xf32, #tpu.memory_space<vmem>>, vector<8x128xf32>
      %c0_14 = arith.constant 0 : index
      %c0_15 = arith.constant 0 : index
      %14 = vector.load %arg4[%c0_14, %c0_15] : memref<8x128xf32, #tpu.memory_space<vmem>>, vector<8x128xf32>
      %cst_16 = arith.constant 2.000000e+00 : f32
      %15 = vector.broadcast %cst_16 : f32 to vector<8x128xf32>
      %16 = arith.mulf %15, %14 : vector<8x128xf32>
      %17 = arith.addf %13, %16 : vector<8x128xf32>
      %18 = vector.broadcast %12 : vector<8x1xf32> to vector<8x128xf32>
      %19 = arith.mulf %17, %18 : vector<8x128xf32>
      %c0_17 = arith.constant 0 : index
      %c0_18 = arith.constant 0 : index
      %20 = vector.load %arg6[%c0_17, %c0_18] : memref<1x128xf32, #tpu.memory_space<vmem>>, vector<1x128xf32>
      %21 = vector.broadcast %20 : vector<1x128xf32> to vector<8x128xf32>
      %22 = arith.addf %19, %21 : vector<8x128xf32>
      %c0_19 = arith.constant 0 : index
      %c0_20 = arith.constant 0 : index
      %23 = vector.load %arg7[%c0_19, %c0_20] : memref<8x128xf32, #tpu.memory_space<vmem>>, vector<8x128xf32>
      tpu.vector_store %arg7[%c0_19, %c0_20], %22 {strides = array<i32>} : memref<8x128xf32, #tpu.memory_space<vmem>>, vector<8x128xf32>,
    } else {
    }
    return
  }
  func.func @transform_0(%arg0: i32, %arg1: i32) -> (i32, i32) {
    %c0_i32 = arith.constant 0 : i32
    return %arg0, %arg1 : i32, i32
  }
  func.func @transform_1(%arg0: i32, %arg1: i32) -> (i32, i32) {
    %c0_i32 = arith.constant 0 : i32
    %c0_i32_0 = arith.constant 0 : i32
    return %arg1, %c0_i32 : i32, i32
  }
  func.func @transform_2(%arg0: i32, %arg1: i32) -> (i32, i32) {
    %c0_i32 = arith.constant 0 : i32
    %c0_i32_0 = arith.constant 0 : i32
    return %arg0, %c0_i32 : i32, i32
  }
  func.func @transform_3(%arg0: i32, %arg1: i32) -> (i32, i32) {
    %c0_i32 = arith.constant 0 : i32
    %c0_i32_0 = arith.constant 0 : i32
    return %arg0, %c0_i32 : i32, i32
  }
  func.func @transform_4(%arg0: i32, %arg1: i32) -> (i32, i32) {
    %c0_i32 = arith.constant 0 : i32
    %c0_i32_0 = arith.constant 0 : i32
    %c0_i32_1 = arith.constant 0 : i32
    return %c0_i32, %c0_i32_0 : i32, i32
  }
  func.func @transform_5(%arg0: i32, %arg1: i32) -> (i32, i32) {
    %c0_i32 = arith.constant 0 : i32
    %c0_i32_0 = arith.constant 0 : i32
    return %arg0, %c0_i32 : i32, i32
  }
}

</mosaic_0001>

<bundles_post_ra>
// kernel: self_loop_attention_gcn.3
= control target key start
LH: loop header
LB: loop body
LE: loop exit
PB: predicated region body
PF: predicated region fallthrough
CT: control target
= control target key end

     0   :  { %s625_s18 = smov 0   ;;  %s627_s19 = smov 0   ;;  %s673_s0 = inlined_call_operand.vmem [shape: f32[16,16], index: 0, kind: input, shape index: {}]   ;;  %s674_s1 = inlined_call_operand.vmem [shape: f32[16,128], index: 1, kind: input, shape index: {}, may-alias: {1,2}]   ;;  %s675_s2 = inlined_call_operand.vmem [shape: f32[16,128], index: 2, kind: input, shape index: {}, may-alias: {1,2}]   ;;  %s676_s3 = inlined_call_operand.vmem [shape: f32[16,1], index: 3, kind: input, shape index: {}]   ;;  %s677_s4 = inlined_call_operand.vmem [shape: f32[1,128], index: 4, kind: input, shape index: {}]   ;;  %s678_s5 = inlined_call_operand.vmem [shape: f32[16,128], index: 5, kind: output, shape index: {}]  }
   0x1   :  { %s629_s20 = smov 0  }
   0x2 LB: > { %s27_s21 = sadd.s32 1, %s585_s19  ;;  %p516_p0 = scmp.ge.s32.totalorder %s589_s20, 1  ;;  %s589_s20 = sphi %s629_s20, %s15_s20   ;;  %s585_s19 = sphi %s627_s19, %s680_s19   ;;  %s581_s18 = sphi %s625_s18, %s679_s18  }
   0x3   : > { %p29_p1 = scmp.ge.s32.totalorder %s27_s21, 2  ;;  %p232_p2 = scmp.lt.s32.totalorder %s589_s20, 3 }
   0x5   : > { %s682_s21 = smov (%p29_p1, %s27_s21), 0  ;;  %p233_p3 = pnand %p516_p0, %p232_p2 }
   0x6   : > { %v306_v0 = vld [vmem:[%s674_s1] sm:$0xff] (!%p233_p3)  ;;  %v307_v1 = vld [vmem:[%s674_s1 + $0x8] sm:$0xff] (!%p233_p3)  ;;  %p274_p4 = scmp.lt.s32.totalorder (!%p233_p3), %s581_s18, 1  ;;  %v591_v2 = vmov (!%p233_p3), 0.0|0.0   ;;  %vm592_vm0 = vmmov (!%p233_p3), 0   ;;  %v593_v4 = vmov (!%p233_p3), 0.0  }
   0x7   : > { %236 = sbr.rel (%p233_p3) target bundleno = 237 (0xed), region = 40  ;;  %535 = vmatprep.subr.bf16.mxu0 (!%p233_p3), %v591_v2  ;;  %v536_v3 = vpack.c.bf16 (!%p233_p3), %v307_v1, %v306_v0  ;;  %532 = vmatprep.mubr.msk.f32.mxu0 (!%p233_p3), %vm592_vm0, %v593_v4  ;;  %v594_v5 = vmov (!%p233_p3), 0   ;;  %vm308_vm1 = vcmask (!%p233_p3), 130048   ;;  %v522_v14 = vld [vmem:[%s677_s4] ss:$0 sm:$0xff] (!%p233_p3) }
   0x8   : > { %566 = vset.pattern.permute.xlu0 (!%p233_p3), %v594_v5 }
   0x9   : > { %537 = vmatpush3.bf16.msra.mxu0 (!%p233_p3), %v536_v3 }
   0xe   : > { %s684_s18 = smov (!%p274_p4, %s581_s18), 1 }
   0xf   : > { %s517_s26 = sshll.u32 %s684_s18, 3 }
  0x10   : > { %s280_s29 = scalar_lea.vmem %s673_s0, %s517_s26  ;;  %s294_s7 = scalar_lea.vmem %s676_s3, %s517_s26 }
  0x11   : > { %v305_v6 = vld [vmem:[%s280_s29] sm:$0xff]  ;;  %s290_s10 = scalar_lea.vmem %s675_s2, %s517_s26  ;;  %s298_s15 = scalar_lea.vmem %s678_s5, %s517_s26 }
  0x12   : > { %v387_v7 = vld [vmem:[%s294_s7] sm:$0xff]  ;;  %533 = vmatmul.mubr.msk.f32.vlgmr.msra.gmra.mrb[0].mxu0 %vm308_vm1, %v305_v6 }
  0x13   : > { %394 = vperm.xlu0 %566, %v387_v7   ;;  %v389_v8 = vld [vmem:[%s290_s10] sm:$0xff] }
  0x14   : > { %v390_v9 = vmul.f32 2.0, %v389_v8 }
  0x92   : > { %v395_v11 = vpop.permute.xlu0 %394 }
  0xe5   : > { %v378_v10 = vpop.f32.mrb[0].mxu0 }
  0xe6   : > { %v391_v12 = vadd.f32 %v390_v9, %v378_v10  ;;  %v534_v13 = vpop.f32.mrb[1].mxu0 }
  0xe8   : > { %v397_v15 = vmul.f32 %v395_v11, %v391_v12 }
  0xea   : > { %v405_v16 = vadd.f32 %v522_v14, %v397_v15 }
  0xec   : > { %406 = vst [vmem:[%s298_s15] sm:$0xff] %v405_v16 }
  0xed PF: > { %s15_s20 = sadd.s32 1, %s589_s20   ;;  %s679_s18 = smov %s585_s19 }
  0xee   : > { %p12_p5 = scmp.ge.s32.totalorder %s15_s20, 4   ;;  %s680_s19 = smov %s682_s21 }
  0xf0   :  { %14 = sbr.rel (!%p12_p5) target bundleno = 2 (0x2), region = 87 }

// kernel: self_loop_attention_gcn.2
= control target key start
LH: loop header
LB: loop body
LE: loop exit
PB: predicated region body
PF: predicated region fallthrough
CT: control target
= control target key end

     0   :  { %s1014_s24 = smov 0   ;;  %s1016_s25 = smov 0   ;;  %s1184_s0 = inlined_call_operand.vmem [shape: f32[16,16], index: 0, kind: input, shape index: {}]   ;;  %s1185_s1 = inlined_call_operand.vmem [shape: f32[16,128], index: 1, kind: input, shape index: {}, may-alias: {1,2}]   ;;  %s1186_s2 = inlined_call_operand.vmem [shape: f32[16,128], index: 2, kind: input, shape index: {}, may-alias: {1,2}]   ;;  %s1187_s3 = inlined_call_operand.vmem [shape: f32[16,1], index: 3, kind: input, shape index: {}]   ;;  %s1188_s4 = inlined_call_operand.vmem [shape: f32[128,128], index: 4, kind: input, shape index: {}]   ;;  %s1189_s5 = inlined_call_operand.vmem [shape: f32[1,128], index: 5, kind: input, shape index: {}]   ;;  %s1190_s6 = inlined_call_operand.vmem [shape: f32[128,128], index: 6, kind: input, shape index: {}]   ;;  %s1191_s7 = inlined_call_operand.vmem [shape: f32[16,128], index: 7, kind: output, shape index: {}]  }
   0x1   :  { %s1018_s26 = smov 0  }
   0x2 LB: > { %s29_s27 = sadd.s32 1, %s964_s25  ;;  %p743_p0 = scmp.ge.s32.totalorder %s968_s26, 1  ;;  %s968_s26 = sphi %s1018_s26, %s17_s26   ;;  %s964_s25 = sphi %s1016_s25, %s1193_s25   ;;  %s960_s24 = sphi %s1014_s24, %s1192_s24  }
   0x3   : > { %p31_p1 = scmp.ge.s32.totalorder %s29_s27, 2  ;;  %p282_p2 = scmp.lt.s32.totalorder %s968_s26, 3 }
   0x5   : > { %s1195_s27 = smov (%p31_p1, %s29_s27), 0  ;;  %p283_p3 = pnand %p743_p0, %p282_p2 }
   0x6   : > { %v360_v0 = vld [vmem:[%s1185_s1] sm:$0xff] (!%p283_p3)  ;;  %v361_v1 = vld [vmem:[%s1185_s1 + $0x8] sm:$0xff] (!%p283_p3)  ;;  %p328_p4 = scmp.lt.s32.totalorder (!%p283_p3), %s960_s24, 1  ;;  %v970_v2 = vmov (!%p283_p3), 0.0|0.0   ;;  %vm971_vm0 = vmmov (!%p283_p3), 0   ;;  %v972_v4 = vmov (!%p283_p3), 0.0  }
   0x7   : > { %286 = sbr.rel (%p283_p3) target bundleno = 665 (0x299), region = 48  ;;  %866 = vmatprep.subr.bf16.mxu0 (!%p283_p3), %v970_v2  ;;  %v867_v3 = vpack.c.bf16 (!%p283_p3), %v361_v1, %v360_v0  ;;  %793 = vmatprep.mubr.msk.f32.mxu0 (!%p283_p3), %vm971_vm0, %v972_v4  ;;  %v452_v5 = vld [vmem:[%s1188_s4] sm:$0xff] (!%p283_p3)  ;;  %v453_v6 = vld [vmem:[%s1188_s4 + $0x8] sm:$0xff] (!%p283_p3)  ;;  %v454_v7 = vld [vmem:[%s1188_s4 + $0x10] sm:$0xff] (!%p283_p3)  ;;  %v973_v8 = vmov (!%p283_p3), 0   ;;  %vm362_vm1 = vcmask (!%p283_p3), 130048  }
   0x8   : > { %945 = vset.pattern.permute.xlu0 (!%p283_p3), %v973_v8  ;;  %869 = vmatprep.subr.bf16.mxu1 (!%p283_p3), %v970_v2  ;;  %v870_v9 = vpack.c.bf16 (!%p283_p3), %v453_v6, %v452_v5  ;;  %v455_v10 = vld [vmem:[%s1188_s4 + $0x18] sm:$0xff] (!%p283_p3)  ;;  %v456_v12 = vld [vmem:[%s1188_s4 + $0x20] sm:$0xff] (!%p283_p3)  ;;  %v457_v13 = vld [vmem:[%s1188_s4 + $0x28] sm:$0xff] (!%p283_p3) }
   0x9   : > { %868 = vmatpush3.bf16.msra.mxu0 (!%p283_p3), %v867_v3  ;;  %828 = vmatprep.mubr.msk.f32.mxu1 (!%p283_p3), %vm971_vm0, %v972_v4  ;;  %v873_v11 = vpack.c.bf16 (!%p283_p3), %v455_v10, %v454_v7  ;;  %v876_v16 = vpack.c.bf16 (!%p283_p3), %v457_v13, %v456_v12  ;;  %v458_v17 = vld [vmem:[%s1188_s4 + $0x30] sm:$0xff] (!%p283_p3)  ;;  %v459_v18 = vld [vmem:[%s1188_s4 + $0x38] sm:$0xff] (!%p283_p3)  ;;  %v460_v20 = vld [vmem:[%s1188_s4 + $0x40] sm:$0xff] (!%p283_p3) }
   0xa   : > { %871 = vmatpush3.bf16.msra.mxu1 (!%p283_p3), %v870_v9  ;;  %893 = vmatprep.subr.bf16.mxu0 (!%p283_p3), %v970_v2  ;;  %v879_v19 = vpack.c.bf16 (!%p283_p3), %v459_v18, %v458_v17  ;;  %v461_v21 = vld [vmem:[%s1188_s4 + $0x48] sm:$0xff] (!%p283_p3)  ;;  %v462_v23 = vld [vmem:[%s1188_s4 + $0x50] sm:$0xff] (!%p283_p3)  ;;  %v463_v24 = vld [vmem:[%s1188_s4 + $0x58] sm:$0xff] (!%p283_p3) }
   0xb   : > { %872 = vmatprep.subr.bf16.mxu1 (!%p283_p3), %v970_v2  ;;  %v882_v22 = vpack.c.bf16 (!%p283_p3), %v461_v21, %v460_v20  ;;  %v885_v25 = vpack.c.bf16 (!%p283_p3), %v463_v24, %v462_v23  ;;  %v464_v26 = vld [vmem:[%s1188_s4 + $0x60] sm:$0xff] (!%p283_p3)  ;;  %v465_v27 = vld [vmem:[%s1188_s4 + $0x68] sm:$0xff] (!%p283_p3)  ;;  %v466_v29 = vld [vmem:[%s1188_s4 + $0x70] sm:$0xff] (!%p283_p3) }
   0xc   : > { %v888_v28 = vpack.c.bf16 (!%p283_p3), %v465_v27, %v464_v26  ;;  %v467_v30 = vld [vmem:[%s1188_s4 + $0x78] sm:$0xff] (!%p283_p3)  ;;  %v546_v32 = vld [vmem:[%s1190_s6] sm:$0xff] (!%p283_p3)  ;;  %v547_v33 = vld [vmem:[%s1190_s6 + $0x8] sm:$0xff] (!%p283_p3) }
   0xd   : > { %v891_v31 = vpack.c.bf16 (!%p283_p3), %v467_v30, %v466_v29  ;;  %v548_v34 = vld [vmem:[%s1190_s6 + $0x10] sm:$0xff] (!%p283_p3)  ;;  %v894_v35 = vpack.c.bf16 (!%p283_p3), %v547_v33, %v546_v32  ;;  %v549_v36 = vld [vmem:[%s1190_s6 + $0x18] sm:$0xff] (!%p283_p3)  ;;  %v550_v38 = vld [vmem:[%s1190_s6 + $0x20] sm:$0xff] (!%p283_p3) }
   0xe   : > { %s1197_s24 = smov (!%p328_p4, %s960_s24), 1  ;;  %874 = vmatpush3.bf16.msra.mxu1 %v873_v11  ;;  %v897_v37 = vpack.c.bf16 %v549_v36, %v548_v34  ;;  %v551_v39 = vld [vmem:[%s1190_s6 + $0x28] sm:$0xff]  ;;  %v552_v41 = vld [vmem:[%s1190_s6 + $0x30] sm:$0xff]  ;;  %v553_v42 = vld [vmem:[%s1190_s6 + $0x38] sm:$0xff] }
   0xf   : > { %s1054_s17 = sshll.u32 %s1197_s24, 3  ;;  %875 = vmatprep.subr.bf16.mxu1 %v970_v2  ;;  %v900_v40 = vpack.c.bf16 %v551_v39, %v550_v38  ;;  %v903_v43 = vpack.c.bf16 %v553_v42, %v552_v41  ;;  %v554_v44 = vld [vmem:[%s1190_s6 + $0x40] sm:$0xff]  ;;  %v555_v45 = vld [vmem:[%s1190_s6 + $0x48] sm:$0xff]  ;;  %v556_v47 = vld [vmem:[%s1190_s6 + $0x50] sm:$0xff] }
  0x10   : > { %s334_s20 = scalar_lea.vmem %s1184_s0, %s1054_s17  ;;  %s348_s23 = scalar_lea.vmem %s1187_s3, %s1054_s17  ;;  %v906_v46 = vpack.c.bf16 %v555_v45, %v554_v44  ;;  %v557_v48 = vld [vmem:[%s1190_s6 + $0x58] sm:$0xff]  ;;  %v558_v50 = vld [vmem:[%s1190_s6 + $0x60] sm:$0xff]  ;;  %v559_v51 = vld [vmem:[%s1190_s6 + $0x68] sm:$0xff] }
  0x11   : > { %v359_v14 = vld [vmem:[%s334_s20] sm:$0xff]  ;;  %v909_v49 = vpack.c.bf16 %v557_v48, %v556_v47  ;;  %v912_v52 = vpack.c.bf16 %v559_v51, %v558_v50  ;;  %s344_s21 = scalar_lea.vmem %s1186_s2, %s1054_s17  ;;  %v560_v60 = vld [vmem:[%s1190_s6 + $0x70] sm:$0xff]  ;;  %v561_v61 = vld [vmem:[%s1190_s6 + $0x78] sm:$0xff]  ;;  %s352_s10 = scalar_lea.vmem %s1191_s7, %s1054_s17 }
  0x12   : > { %v441_v15 = vld [vmem:[%s348_s23] sm:$0xff]  ;;  %794 = vmatmul.mubr.msk.f32.vlgmr.msra.gmra.mrb[0].mxu0 %vm362_vm1, %v359_v14  ;;  %877 = vmatpush3.bf16.msra.mxu1 %v876_v16  ;;  %v915_v62 = vpack.c.bf16 %v561_v61, %v560_v60 }
  0x13   : > { %448 = vperm.xlu0 %945, %v441_v15   ;;  %863 = vmatprep.mubr.msk.f32.mxu0 %vm971_vm0, %v972_v4  ;;  %v443_v53 = vld [vmem:[%s344_s21] sm:$0xff] }
  0x14   : > { %878 = vmatprep.subr.bf16.mxu1 %v970_v2  ;;  %895 = vmatpush3.bf16.msra.mxu0 %v894_v35  ;;  %v444_v54 = vmul.f32 2.0, %v443_v53  ;;  %v749_v63 = vld [vmem:[%s1189_s5] ss:$0 sm:$0xff] }
  0x15   : > { %896 = vmatprep.subr.bf16.mxu0 %v970_v2 }
  0x16   : > { %880 = vmatpush3.bf16.msra.mxu1 %v879_v19 }
  0x17   : > { %881 = vmatprep.subr.bf16.mxu1 %v970_v2 }
  0x18   : > { %898 = vmatpush3.bf16.msra.mxu0 %v897_v37 }
  0x19   : > { %899 = vmatprep.subr.bf16.mxu0 %v970_v2 }
  0x1a   : > { %883 = vmatpush3.bf16.msra.mxu1 %v882_v22 }
  0x1b   : > { %884 = vmatprep.subr.bf16.mxu1 %v970_v2 }
  0x1c   : > { %901 = vmatpush3.bf16.msra.mxu0 %v900_v40 }
  0x1d   : > { %902 = vmatprep.subr.bf16.mxu0 %v970_v2 }
  0x1e   : > { %886 = vmatpush3.bf16.msra.mxu1 %v885_v25 }
  0x1f   : > { %887 = vmatprep.subr.bf16.mxu1 %v970_v2 }
  0x20   : > { %904 = vmatpush3.bf16.msra.mxu0 %v903_v43 }
  0x21   : > { %905 = vmatprep.subr.bf16.mxu0 %v970_v2 }
  0x22   : > { %889 = vmatpush3.bf16.msra.mxu1 %v888_v28 }
  0x23   : > { %890 = vmatprep.subr.bf16.mxu1 %v970_v2 }
  0x24   : > { %907 = vmatpush3.bf16.msra.mxu0 %v906_v46 }
  0x25   : > { %908 = vmatprep.subr.bf16.mxu0 %v970_v2 }
  0x26   : > { %892 = vmatpush3.bf16.msra.mxu1 %v891_v31 }
  0x28   : > { %910 = vmatpush3.bf16.msra.mxu0 %v909_v49 }
  0x29   : > { %911 = vmatprep.subr.bf16.mxu0 %v970_v2 }
  0x2c   : > { %913 = vmatpush3.bf16.msra.mxu0 %v912_v52 }
  0x2d   : > { %914 = vmatprep.subr.bf16.mxu0 %v970_v2 }
  0x30   : > { %916 = vmatpush3.bf16.msra.mxu0 %v915_v62 }
  0x92   : > { %v449_v56 = vpop.permute.xlu0 %448 }
  0xe5   : > { %v432_v55 = vpop.f32.mrb[0].mxu0 }
  0xe6   : > { %v445_v57 = vadd.f32 %v444_v54, %v432_v55  ;;  %v795_v58 = vpop.f32.mrb[1].mxu0 }
  0xe8   : > { %v451_v59 = vmul.f32 %v449_v56, %v445_v57 }
  0xea   : > { %829 = vmatmul.mubr.f32.vlgmr.msra.gmra.mrb[0].mxu1 %v451_v59 }
 0x1bd   : > { %v541_v0 = vpop.f32.mrb[0].mxu1 }
 0x1be   : > { %v542_v1 = vadd.f32 %v749_v63, %v541_v0  ;;  %v830_v2 = vpop.f32.mrb[1].mxu1 }
 0x1c0   : > { %v545_v3 = vmax.f32 %v542_v1, 0.0 }
 0x1c2   : > { %864 = vmatmul.mubr.f32.vlgmr.msra.gmra.mrb[2].mxu0 %v545_v3 }
 0x295   : > { %v628_v4 = vpop.f32.mrb[2].mxu0 }
 0x296   : > { %v632_v5 = vmul.f32 %v628_v4, %v449_v56  ;;  %v865_v6 = vpop.f32.mrb[3].mxu0 }
 0x298   : > { %633 = vst [vmem:[%s352_s10] sm:$0xff] %v632_v5 }
 0x299 PF: > { %s17_s26 = sadd.s32 1, %s968_s26   ;;  %s1192_s24 = smov %s964_s25 }
 0x29a   : > { %p14_p5 = scmp.ge.s32.totalorder %s17_s26, 4   ;;  %s1193_s25 = smov %s1195_s27 }
 0x29c   :  { %16 = sbr.rel (!%p14_p5) target bundleno = 2 (0x2), region = 95 }

</bundles_post_ra>
